<compile_context>
chip_gen: v7x
topology: tpu7x:2x2x1
jax: 0.10.0
libtpu: 0.0.40
codegen_flags: <defaults>
</compile_context>

<pallas_src>
import jax
import jax.numpy as jnp
from jax.experimental import pallas as pl
from jax.experimental.pallas import tpu as pltpu


_LANE = 128
# Per-tile byte budget. Double-buffered input + output tiles => ~4x this
# (~16 MiB) of pipelined VMEM: safe on v5e/v6e (128 MiB physical) and on
# v7x (64 MiB per TC) once the scoped limit below is applied.
_TILE_BYTES = 4 * 1024 * 1024
_MAX_TILE = 1024                 # fallback square-ish tile cap (multiple of 128)
_VMEM_LIMIT = 48 * 1024 * 1024   # explicit scoped-VMEM limit (v5e default is only 16 MiB)


def _best_tile(dim: int, max_tile: int) -> int:
    """Block size for `dim`: full extent if it fits, else the multiple of 128
    <= max_tile that minimizes tail (out-of-bounds) padding; ties -> larger tile."""
    if dim <= max_tile:
        return dim
    start = max((max_tile // _LANE) * _LANE, _LANE)
    best_t, best_pad = _LANE, None
    for cand in range(start, _LANE - 1, -_LANE):
        pad = (-dim) % cand
        if best_pad is None or pad < best_pad:
            best_t, best_pad = cand, pad
            if pad == 0:
                break
    return best_t


def _choose_tiles(S: int, H: int, itemsize: int):
    """Pick (TS, TH). Every returned tile dim is either the full extent or a
    multiple of 128, satisfying the (8, 128) constraint for BOTH the input
    (TS, TH) and output (TH, TS) blocks."""
    budget = max(_TILE_BYTES // itemsize, _LANE * _LANE)
    # 1) Whole (S, H) plane fits: contiguous reads AND contiguous writes.
    if S * H <= budget:
        return S, H
    # 2) Keep reads contiguous (input layout (B, S, H)): full H, tile S.
    max_ts = budget // H
    if max_ts >= _LANE:
        return _best_tile(S, max_ts), H
    # 3) Keep writes contiguous & lane-dense (output layout (B, H, S)): full S, tile H.
    max_th = budget // S
    if max_th >= _LANE:
        return S, _best_tile(H, max_th)
    # 4) Both dims huge: square-ish 128-multiple tiles within the budget.
    cap = max(_LANE, min(_MAX_TILE, int((budget ** 0.5) // _LANE) * _LANE))
    return _best_tile(S, cap), _best_tile(H, cap)


def _transpose_kernel(x_ref, o_ref):
    # x_ref: (TS, TH) tile of one batch element; o_ref: (TH, TS) tile.
    o_ref[...] = x_ref[...].T


def transpose_dimensions(x):
    """Pallas equivalent of torch `input_tensor.transpose(0, 2, 1)`: (B,S,H)->(B,H,S)."""
    B, S, H = x.shape
    itemsize = jnp.dtype(x.dtype).itemsize
    TS, TH = _choose_tiles(S, H, itemsize)
    grid = (B, pl.cdiv(S, TS), pl.cdiv(H, TH))
    return pl.pallas_call(
        _transpose_kernel,
        out_shape=jax.ShapeDtypeStruct((B, H, S), x.dtype),
        grid_spec=pltpu.PrefetchScalarGridSpec(
            num_scalar_prefetch=0,
            grid=grid,
            in_specs=[
                # input (B, S, H): block (1[squeezed], TS, TH) at block index (b, s, h)
                pl.BlockSpec((None, TS, TH), lambda b, s, h: (b, s, h)),
            ],
            # output (B, H, S): block (1[squeezed], TH, TS) at block index (b, h, s)
            out_specs=pl.BlockSpec((None, TH, TS), lambda b, s, h: (b, h, s)),
        ),
        compiler_params=pltpu.CompilerParams(
            dimension_semantics=("parallel", "parallel", "parallel"),
            vmem_limit_bytes=_VMEM_LIMIT,
        ),
        cost_estimate=pl.CostEstimate(
            flops=0,
            transcendentals=0,
            bytes_accessed=2 * B * S * H * itemsize,
        ),
    )(x)


if __name__ == "__main__":
    key = jax.random.PRNGKey(0)

    # Small shape consistent with the module (single full-extent block path:
    # grid (2, 1, 1), one contiguous read/write per batch element).
    B, S, H = 2, 8, 32
    x = jax.random.normal(key, (B, S, H), dtype=jnp.float32)
    out = jax.block_until_ready(transpose_dimensions(x))
    ref = jnp.transpose(x, (0, 2, 1))
    assert out.shape == (B, H, S), out.shape
    assert jnp.allclose(out, ref), "mismatch vs reference transpose (small)"

    # Shape that exercises the tiled, contiguous-read path:
    # 2048*768*4B = 6 MiB > 4 MiB budget -> TH = H = 768, TS = 1024, grid (1, 2, 1).
    B2, S2, H2 = 1, 2048, 768
    x2 = jax.random.normal(jax.random.PRNGKey(1), (B2, S2, H2), dtype=jnp.float32)
    out2 = jax.block_until_ready(transpose_dimensions(x2))
    ref2 = jnp.transpose(x2, (0, 2, 1))
    assert out2.shape == (B2, H2, S2), out2.shape
    assert jnp.allclose(out2, ref2), "mismatch vs reference transpose (tiled)"

    print("KERNEL_OK")
</pallas_src>

<mosaic_0001>
module attributes {stable_mosaic.version = 11 : i64} {
  func.func @_transpose_kernel(%arg0: i32, %arg1: i32, %arg2: i32, %arg3: memref<1x8x32xf32, #tpu.memory_space<vmem>>, %arg4: memref<1x32x8xf32, #tpu.memory_space<vmem>>) attributes {dimension_semantics = [#tpu.dimension_semantics<parallel>, #tpu.dimension_semantics<parallel>, #tpu.dimension_semantics<parallel>], iteration_bounds = array<i64: 2, 1, 1>, scalar_prefetch = 0 : i64, scratch_operands = 0 : i64, tpu.core_type = #tpu.core_type<tc>, window_params = [{transform_indices = @transform_0, window_bounds = array<i64: 1, 8, 32>}, {transform_indices = @transform_1, window_bounds = array<i64: 1, 32, 8>}]} {
    %c0 = arith.constant 0 : index
    %c0_0 = arith.constant 0 : index
    %c0_1 = arith.constant 0 : index
    %0 = vector.load %arg3[%c0, %c0_0, %c0_1] : memref<1x8x32xf32, #tpu.memory_space<vmem>>, vector<1x8x32xf32>
    %1 = vector.shape_cast %0 : vector<1x8x32xf32> to vector<8x32xf32>
    %2 = tpu.transpose %1, [1, 0] : vector<8x32xf32> -> vector<32x8xf32>
    %c0_2 = arith.constant 0 : index
    %c0_3 = arith.constant 0 : index
    %c0_4 = arith.constant 0 : index
    %3 = vector.load %arg4[%c0_2, %c0_3, %c0_4] : memref<1x32x8xf32, #tpu.memory_space<vmem>>, vector<1x32x8xf32>
    %4 = vector.shape_cast %3 : vector<1x32x8xf32> to vector<32x8xf32>
    %5 = vector.shape_cast %2 : vector<32x8xf32> to vector<1x32x8xf32>
    tpu.vector_store %arg4[%c0_2, %c0_3, %c0_4], %5 {strides = array<i32>} : memref<1x32x8xf32, #tpu.memory_space<vmem>>, vector<1x32x8xf32>,
    return
  }
  func.func @transform_0(%arg0: i32, %arg1: i32, %arg2: i32) -> (i32, i32, i32) {
    %c0_i32 = arith.constant 0 : i32
    return %arg0, %arg1, %arg2 : i32, i32, i32
  }
  func.func @transform_1(%arg0: i32, %arg1: i32, %arg2: i32) -> (i32, i32, i32) {
    %c0_i32 = arith.constant 0 : i32
    return %arg0, %arg2, %arg1 : i32, i32, i32
  }
}

</mosaic_0001>

<bundles_post_ra>
// kernel: tpu_custom_call.1
= control target key start
LH: loop header
LB: loop body
LE: loop exit
PB: predicated region body
PF: predicated region fallthrough
CT: control target
= control target key end

     0   :  { %6 = vsyncpa [#allocation3], 0  ;;  %s610_s0 = inlined_call_operand.hbm [shape: f32[2,8,32], index: 0, kind: input, shape index: {}]   ;;  %s611_s1 = inlined_call_operand.vmem [shape: f32[2,32,8], index: 1, kind: output, shape index: {}]  }
   0x1   :  { %8 = vsyncpa [#allocation3 + $0x1], 0  ;;  %s485_s6 = smov 0   ;;  %s487_s7 = smov 0  }
   0x2   :  { %s489_s8 = smov 0   ;;  %s491_s9 = smov 0  }
   0x3   :  { %s493_s10 = smov 0   ;;  %s495_s11 = smov 0  }
   0x4 LB: > { %s323_s12 = sadd.s32 4294967295, %s472_s11   ;;  %s33_s13 = sadd.s32 1, %s468_s10  ;;  %s472_s11 = sphi %s495_s11, %s14_s11   ;;  %s468_s10 = sphi %s493_s10, %s621_s10   ;;  %s464_s9 = sphi %s491_s9, %s620_s9   ;;  %s460_s8 = sphi %s489_s8, %s619_s8   ;;  %s456_s7 = sphi %s487_s7, %s618_s7   ;;  %s452_s6 = sphi %s485_s6, %s617_s6  }
   0x5   : > { %p35_p0 = scmp.ge.s32.totalorder %s33_s13, 2  ;;  %s44_s14 = sadd.s32 1, %s460_s8 }
   0x6   : > { %p51_p1 = scmp.ne.s32.totalorder %s460_s8, %s456_s7  ;;  %p52_p2 = scmp.eq.s32.totalorder %s472_s11, 0 }
   0x7   : > { %s623_s13 = smov (%p35_p0, %s33_s13), 0  ;;  %p57_p4 = scmp.ne.s32.totalorder %s456_s7, %s452_s6 }
   0x8   : > { %p521_p3 = por %p52_p2, %p51_p1  ;;  %s37_s16 = ssub.s32 %s468_s10, %s623_s13 }
   0x9   : > { %p58_p5 = scmp.eq.s32.totalorder %s323_s12, 0  ;;  %p42_p6 = scmp.eq.s32.totalorder %s37_s16, 0 }
   0xa   : > { %p342_p8 = scmp.lt.s32.totalorder %s472_s11, 2  ;;  %s111_s19 = sand.u32 1, %s460_s8  }
   0xb   : > { %p528_p7 = por %p58_p5, %p57_p4  ;;  %s328_s20 = sshll.u32 %s468_s10, 7 }
   0xc   : > { %s534_s18 = scalar_select %p42_p6, %s460_s8, %s44_s14  }
   0xd   : > { %s327_s21 = sshll.u32 %s111_s19, 3  ;;  %s541_s24 = scalar_lea.hbm %s610_s0, %s328_s20 }
   0xe   : > { %s115_s25 = scalar_lea.vmem [#allocation2], %s327_s21  ;;  %p545_p9 = pnand %p342_p8, %p521_p3 }
   0xf   : > { %s124_s26 = sshll.u32 %s115_s25, 4  ;;  %s112_s28 = scalar_lea.sflag [#allocation3], %s111_s19  ;;  %s549_s26 = int_to_ptr.vmem [resolvable:$true] %s124_s26 }
  0x10   : > { %s392_s29 = scalar_lea.hbm %s541_s24, 128  ;;  %p394_p13 = pneg %p545_p9 }
  0x11   : > { %p393_p12 = scmp.ne.s32.totalorder %s541_s24, %s392_s29  ;;  %s397_s3 = scalar_lea.hbm %s610_s0, 256 }
  0x12   : > { %p398_p2 = scmp.lt.u32.totalorder %s541_s24, %s610_s0  ;;  %p399_p3 = scmp.lt.u32.totalorder %s397_s3, %s392_s29 }
  0x13   : > { %p395_p0 = pnand %p394_p13, %p393_p12  ;;  %p401_p5 = scmp.lt.u32.totalorder %s392_s29, %s541_s24 }
  0x14   : > { %p400_p4 = por %p399_p3, %p398_p2 }
  0x15   : > { %p396_p1 = pneg %p395_p0 }
  0x16   : > { %p402_p6 = por %p401_p5, %p400_p4 }
  0x18   : > { %p403_p8 = pnand %p402_p6, %p396_p1 }
  0x1a   : > { %406 = shalt.err (!%p403_p8)
}
  0x1b   : > { %s407_s6 = scalar_lea.vmem %s549_s26, 128  ;;  %s474_s12 = smov [#allocation2]  }
  0x1c   : > { %p408_p12 = scmp.ne.s32.totalorder %s549_s26, %s407_s6  ;;  %s412_s14 = sshll.u32 %s474_s12, 4  ;;  %s413_s14 = int_to_ptr.vmem [resolvable:$false] %s412_s14 }
  0x1d   : > { %s414_s15 = scalar_lea.vmem %s413_s14, 256  ;;  %p415_p11 = scmp.lt.s32.totalorder %s549_s26, %s413_s14 }
  0x1e   : > { %p410_p0 = pnand %p408_p12, %p394_p13  ;;  %p416_p2 = scmp.lt.s32.totalorder %s414_s15, %s407_s6 }
  0x20   : > { %p411_p10 = pneg %p410_p0  ;;  %p417_p3 = por %p416_p2, %p415_p11 }
  0x22   : > { %p418_p4 = pnand %p417_p3, %p411_p10 }
  0x24   : > { %421 = shalt.err (!%p418_p4)
}
  0x25   : > { %341 = dma.hbm_to_vmem [thread:$0]  (!%p545_p9), %s541_s24, 128, %s549_s26, %s112_s28  }
  0x26   : > { %p615_p1 = scmp.lt.s32.totalorder %s472_s11, 3  ;;  %p616_p5 = scmp.ge.s32.totalorder %s472_s11, 1 }
  0x28   : > { %p130_p13 = pnand %p616_p5, %p615_p1 }
  0x29   : > { %s135_s16 = sand.u32 (!%p130_p13), 1, %s456_s7  }
  0x2a   : > { %133 = sbr.rel (%p130_p13) target bundleno = 193 (0xc1), region = 24  ;;  %s330_s19 = sshll.u32 (!%p130_p13), %s135_s16, 3 }
  0x2b   : > { %s136_s20 = scalar_lea.sflag (!%p130_p13), [#allocation3], %s135_s16  ;;  %s139_s21 = scalar_lea.vmem (!%p130_p13), [#allocation2], %s330_s19 }
  0x31   : > { %447 = dma.done.wait (%p528_p7), %s136_s20, 128  }
  0x32   : > { %449 = vsyncadd (%p528_p7), %s136_s20, 4294967168  ;;  %v178_v0 = vld [vmem:[%s139_s21] sm:$0xff]  ;;  %p166_p9 = scmp.lt.s32.totalorder %s464_s9, 1  ;;  %vm211_vm0 = vcmask 64512  }
  0x33   : > { %179 = vxpose.xlu0.b32.start.end [1/1] (short) (narrow) %v178_v0, 32 }
  0x34   : > { %s625_s9 = smov (!%p166_p9, %s464_s9), 1 }
  0x35   : > { %s335_s22 = sshll.u32 %s625_s9, 5 }
  0x36   : > { %s176_s25 = scalar_lea.vmem %s611_s1, %s335_s22 }
  0xb3   : > { %v195_v1 = vpop.trf.xlu0 }
  0xb4   : > { %212 = vst.msk [vmem:[%s176_s25] sm:$0xff] %vm211_vm0, %v195_v1 }
  0xb7   : > { %v196_v2 = vpop.trf.xlu0 }
  0xb8   : > { %213 = vst.msk [vmem:[%s176_s25 + $0x8] sm:$0xff] %vm211_vm0, %v196_v2 }
  0xbb   : > { %v197_v3 = vpop.trf.xlu0 }
  0xbc   : > { %214 = vst.msk [vmem:[%s176_s25 + $0x10] sm:$0xff] %vm211_vm0, %v197_v3 }
  0xbf   : > { %v198_v4 = vpop.trf.xlu0 }
  0xc0   : > { %215 = vst.msk [vmem:[%s176_s25 + $0x18] sm:$0xff] %vm211_vm0, %v198_v4 }
  0xc1 PF: > { %s14_s11 = sadd.s32 1, %s472_s11   ;;  %s617_s6 = smov %s456_s7 }
  0xc2   : > { %p11_p7 = scmp.ge.s32.totalorder %s14_s11, 4   ;;  %s618_s7 = smov %s460_s8 }
  0xc3   : > { %s619_s8 = smov %s534_s18  ;;  %s620_s9 = smov %s468_s10 }
  0xc4   : > { %s621_s10 = smov %s623_s13  ;;  %13 = sbr.rel (!%p11_p7) target bundleno = 4 (0x4), region = 64 }
  0xcb   :  { %252 = vsyncpa [#allocation3], 1 }
  0xcc   :  { %254 = vsyncpa [#allocation3 + $0x1], 1 }

</bundles_post_ra>
